<compile_context>
chip_gen: v7x
topology: tpu7x:2x2x1
jax: 0.10.0
libtpu: 0.0.40
codegen_flags: <defaults>
</compile_context>

<pallas_src>
import functools

import jax
import jax.numpy as jnp
from jax.experimental import pallas as pl
from jax.experimental.pallas import tpu as pltpu


# PIL .convert('L') coefficients (ITU-R 601-2 luma transform).
_GRAY_R, _GRAY_G, _GRAY_B = 0.299, 0.587, 0.114


def _gaussian_kernel1d(kernel_size: int, sigma):
    # Matches torchvision._get_gaussian_kernel1d
    half = (kernel_size - 1) * 0.5
    x = jnp.linspace(-half, half, kernel_size, dtype=jnp.float32)
    pdf = jnp.exp(-0.5 * (x / sigma) ** 2)
    return pdf / jnp.sum(pdf)


def _blur_kernel(w_ref, x_ref, o_ref, *, ksize: int, channels: int):
    """Separable Gaussian blur with reflect padding (and optional RGB->L) fused in-kernel.

    w_ref: (K,)            1-D gaussian weights (SMEM, scalar reads).
    x_ref: (Bn, H, W)      if channels == 1   (unpadded grayscale block)
           (Bn, 3, H, W)   if channels == 3   (unpadded RGB block)
    o_ref: (Bn, H, W)      blurred grayscale output block.

    blur_v(reflect_pad_H(blur_h(reflect_pad_W(x)))) == full 2-D blur of the reflect-padded
    image, because reflect padding only duplicates rows/cols and the 1-D blur commutes with
    that duplication (torchvision pads with mode='reflect' before the depthwise conv).
    """
    pad = ksize // 2
    _, H, W = o_ref.shape

    # Single up-cast to f32; RGB -> 'L' fused here (one HBM read of the 3-channel block).
    if channels == 3:
        xb = x_ref[...]
        x = (_GRAY_R * xb[:, 0].astype(jnp.float32)
             + _GRAY_G * xb[:, 1].astype(jnp.float32)
             + _GRAY_B * xb[:, 2].astype(jnp.float32))
    else:
        x = x_ref[...].astype(jnp.float32)

    # Hoist the K scalar weight reads (SMEM) out of both tap loops.
    w = [w_ref[j] for j in range(ksize)]

    # ---- reflect pad along W (lane axis), built in VMEM from boundary columns ----
    if pad > 0:
        left = [x[:, :, pad - j:pad - j + 1] for j in range(pad)]      # cols pad .. 1
        right = [x[:, :, W - 2 - j:W - 1 - j] for j in range(pad)]     # cols W-2 .. W-1-pad
        xpw = jnp.concatenate(left + [x] + right, axis=2)              # (Bn, H, W + 2p)
    else:
        xpw = x

    # ---- horizontal pass: K lane-shifted taps (each weight broadcast once) ----
    t = w[0] * xpw[:, :, 0:W]
    for j in range(1, ksize):
        t = t + w[j] * xpw[:, :, j:j + W]

    # ---- reflect pad the intermediate along H (sublane axis) ----
    if pad > 0:
        top = [t[:, pad - i:pad - i + 1, :] for i in range(pad)]
        bot = [t[:, H - 2 - i:H - 1 - i, :] for i in range(pad)]
        tph = jnp.concatenate(top + [t] + bot, axis=1)                 # (Bn, H + 2p, W)
    else:
        tph = t

    # ---- vertical pass: K sublane-shifted taps ----
    acc = w[0] * tph[:, 0:H, :]
    for i in range(1, ksize):
        acc = acc + w[i] * tph[:, i:i + H, :]

    o_ref[...] = acc.astype(o_ref.dtype)


def _pick_block_batch(N: int, C: int, H: int, W: int,
                      budget_bytes: int = 8 * 1024 * 1024) -> int:
    """Largest divisor of N keeping the whole VMEM footprint (double-buffered input block,
    double-buffered output block, ~5 f32 intermediates) under `budget_bytes`."""
    per_image = (2 * C + 8) * H * W * 4
    target = max(1, budget_bytes // per_image)
    bn = 1
    for d in range(1, N + 1):
        if N % d == 0 and d <= target:
            bn = d
    return bn


def gaussian_blur_pallas(x, kernel1d, kernel_size: int):
    """Gaussian blur of grayscale-converted images.

    x: (N, C, H, W) float32 with C in {1, 3}; kernel1d: (K,) normalized weights.
    Returns (N, 1, H, W) float32 (the 'L' image list).
    """
    N, C, H, W = x.shape
    k = int(kernel_size)
    assert k % 2 == 1 and k // 2 < min(H, W), "odd kernel_size smaller than image required"
    assert C in (1, 3), "only grayscale (C=1) or RGB (C=3) inputs are modeled"

    bn = _pick_block_batch(N, C, H, W)

    if C == 3:
        xin = x
        in_spec = pl.BlockSpec((bn, C, H, W), lambda n: (n, 0, 0, 0))
    else:
        xin = x.reshape(N, H, W)
        in_spec = pl.BlockSpec((bn, H, W), lambda n: (n, 0, 0))

    out = pl.pallas_call(
        functools.partial(_blur_kernel, ksize=k, channels=C),
        out_shape=jax.ShapeDtypeStruct((N, H, W), x.dtype),
        grid_spec=pltpu.PrefetchScalarGridSpec(
            num_scalar_prefetch=0,
            grid=(N // bn,),
            in_specs=[
                # (K,) weight table -> SMEM, read as scalars inside the kernel.
                pl.BlockSpec(memory_space=pltpu.MemorySpace.SMEM),
                # Bn unpadded images per grid step (full H/W extent per block).
                in_spec,
            ],
            out_specs=pl.BlockSpec((bn, H, W), lambda n: (n, 0, 0)),
        ),
        compiler_params=pltpu.CompilerParams(
            # Each block is independent -> shardable across TensorCores (v7x megacore).
            dimension_semantics=("parallel",),
        ),
    )(kernel1d.astype(jnp.float32), xin)

    return out.reshape(N, 1, H, W)


class GaussianBlurFucPallas:
    """JAX/Pallas port of GaussianBlurFuc."""

    def __init__(self, kernel_size: int, sigma=(0.1, 2.0)):
        self.kernel_size = int(kernel_size)
        self.sigma_range = (float(sigma[0]), float(sigma[1]))

    def __call__(self, x, key):
        # get_params: sigma ~ Uniform(sigma_min, sigma_max), one draw per forward call.
        sigma = jax.random.uniform(
            key, (), minval=self.sigma_range[0], maxval=self.sigma_range[1],
            dtype=jnp.float32,
        )
        k1 = _gaussian_kernel1d(self.kernel_size, sigma)  # separable 1-D kernel, sums to 1
        return gaussian_blur_pallas(x, k1, self.kernel_size)


# ------------------------- pure-JAX reference (correctness check) -------------------------

def _to_gray(x):
    N, C, H, W = x.shape
    if C == 3:
        g = _GRAY_R * x[:, 0] + _GRAY_G * x[:, 1] + _GRAY_B * x[:, 2]
        return g[:, None, :, :]
    return x


def _reference_blur(x, k1, kernel_size: int):
    """.convert('L') + full 2-D depthwise conv on a reflect-padded image (torchvision float)."""
    g = _to_gray(x.astype(jnp.float32))
    pad = kernel_size // 2
    _, _, H, W = g.shape
    gp = jnp.pad(g, ((0, 0), (0, 0), (pad, pad), (pad, pad)), mode="reflect")
    k2 = jnp.outer(k1, k1)
    out = jnp.zeros_like(g)
    for i in range(kernel_size):
        for j in range(kernel_size):
            out = out + k2[i, j] * gp[:, :, i:i + H, j:j + W]
    return out


def _check(x, key, kernel_size: int):
    blur = GaussianBlurFucPallas(kernel_size=kernel_size, sigma=(0.1, 2.0))
    y = jax.block_until_ready(blur(x, key))
    N, _, H, W = x.shape
    assert y.shape == (N, 1, H, W) and y.dtype == x.dtype
    # Recompute the same sigma draw for the reference.
    sigma = jax.random.uniform(key, (), minval=0.1, maxval=2.0, dtype=jnp.float32)
    y_ref = _reference_blur(x, _gaussian_kernel1d(kernel_size, sigma), kernel_size)
    err = float(jnp.max(jnp.abs(y - y_ref)))
    assert err < 1e-5, f"max abs error vs reference: {err}"
    return y


if __name__ == "__main__":
    key = jax.random.PRNGKey(0)
    k_g_img, k_g_sig, k_c_img, k_c_sig, k_b_img, k_b_sig = jax.random.split(key, 6)

    # "itemlist" of 2 already-grayscale 16x16 images (NCHW, C=1).
    x_gray = jax.random.uniform(k_g_img, (2, 1, 16, 16), dtype=jnp.float32)
    _check(x_gray, k_g_sig, kernel_size=5)

    # "itemlist" of 2 RGB 16x16 images -> .convert('L') fused into the kernel.
    x_rgb = jax.random.uniform(k_c_img, (2, 3, 16, 16), dtype=jnp.float32)
    _check(x_rgb, k_c_sig, kernel_size=5)

    # Larger lane-dense / multi-grid-step case: 16 grayscale 128x128 images (bn=8 -> grid=(2,)).
    x_big = jax.random.uniform(k_b_img, (16, 1, 128, 128), dtype=jnp.float32)
    _check(x_big, k_b_sig, kernel_size=5)

    print("KERNEL_OK")
</pallas_src>

<mosaic_0001>
module attributes {stable_mosaic.version = 11 : i64} {
  func.func @_blur_kernel(%arg0: i32, %arg1: memref<5xf32, #tpu.memory_space<smem>>, %arg2: memref<2x16x16xf32, #tpu.memory_space<vmem>>, %arg3: memref<2x16x16xf32, #tpu.memory_space<vmem>>) attributes {dimension_semantics = [#tpu.dimension_semantics<parallel>], iteration_bounds = array<i64: 1>, scalar_prefetch = 0 : i64, scratch_operands = 0 : i64, tpu.core_type = #tpu.core_type<tc>, window_params = [{transform_indices = @transform_0, window_bounds = array<i64: 5>}, {transform_indices = @transform_1, window_bounds = array<i64: 2, 16, 16>}, {transform_indices = @transform_2, window_bounds = array<i64: 2, 16, 16>}]} {
    %c0 = arith.constant 0 : index
    %c0_0 = arith.constant 0 : index
    %c0_1 = arith.constant 0 : index
    %0 = vector.load %arg2[%c0, %c0_0, %c0_1] : memref<2x16x16xf32, #tpu.memory_space<vmem>>, vector<2x16x16xf32>
    %c0_2 = arith.constant 0 : index
    %1 = memref.load %arg1[%c0_2] : memref<5xf32, #tpu.memory_space<smem>>
    %c1 = arith.constant 1 : index
    %2 = memref.load %arg1[%c1] : memref<5xf32, #tpu.memory_space<smem>>
    %c2 = arith.constant 2 : index
    %3 = memref.load %arg1[%c2] : memref<5xf32, #tpu.memory_space<smem>>
    %c3 = arith.constant 3 : index
    %4 = memref.load %arg1[%c3] : memref<5xf32, #tpu.memory_space<smem>>
    %c4 = arith.constant 4 : index
    %5 = memref.load %arg1[%c4] : memref<5xf32, #tpu.memory_space<smem>>
    %6 = vector.extract_strided_slice %0 {offsets = [0, 0, 2], sizes = [2, 16, 1], strides = [1, 1, 1]} : vector<2x16x16xf32> to vector<2x16x1xf32>
    %7 = vector.extract_strided_slice %0 {offsets = [0, 0, 1], sizes = [2, 16, 1], strides = [1, 1, 1]} : vector<2x16x16xf32> to vector<2x16x1xf32>
    %8 = vector.extract_strided_slice %0 {offsets = [0, 0, 14], sizes = [2, 16, 1], strides = [1, 1, 1]} : vector<2x16x16xf32> to vector<2x16x1xf32>
    %9 = vector.extract_strided_slice %0 {offsets = [0, 0, 13], sizes = [2, 16, 1], strides = [1, 1, 1]} : vector<2x16x16xf32> to vector<2x16x1xf32>
    %10 = tpu.concatenate %6, %7, %0, %8, %9 in 2 : vector<2x16x1xf32>, vector<2x16x1xf32>, vector<2x16x16xf32>, vector<2x16x1xf32>, vector<2x16x1xf32> -> vector<2x16x20xf32>
    %11 = vector.extract_strided_slice %10 {offsets = [0, 0, 0], sizes = [2, 16, 16], strides = [1, 1, 1]} : vector<2x16x20xf32> to vector<2x16x16xf32>
    %12 = vector.broadcast %1 : f32 to vector<2x16x16xf32>
    %13 = arith.mulf %12, %11 : vector<2x16x16xf32>
    %14 = vector.extract_strided_slice %10 {offsets = [0, 0, 1], sizes = [2, 16, 16], strides = [1, 1, 1]} : vector<2x16x20xf32> to vector<2x16x16xf32>
    %15 = vector.broadcast %2 : f32 to vector<2x16x16xf32>
    %16 = arith.mulf %15, %14 : vector<2x16x16xf32>
    %17 = arith.addf %13, %16 : vector<2x16x16xf32>
    %18 = vector.extract_strided_slice %10 {offsets = [0, 0, 2], sizes = [2, 16, 16], strides = [1, 1, 1]} : vector<2x16x20xf32> to vector<2x16x16xf32>
    %19 = vector.broadcast %3 : f32 to vector<2x16x16xf32>
    %20 = arith.mulf %19, %18 : vector<2x16x16xf32>
    %21 = arith.addf %17, %20 : vector<2x16x16xf32>
    %22 = vector.extract_strided_slice %10 {offsets = [0, 0, 3], sizes = [2, 16, 16], strides = [1, 1, 1]} : vector<2x16x20xf32> to vector<2x16x16xf32>
    %23 = vector.broadcast %4 : f32 to vector<2x16x16xf32>
    %24 = arith.mulf %23, %22 : vector<2x16x16xf32>
    %25 = arith.addf %21, %24 : vector<2x16x16xf32>
    %26 = vector.extract_strided_slice %10 {offsets = [0, 0, 4], sizes = [2, 16, 16], strides = [1, 1, 1]} : vector<2x16x20xf32> to vector<2x16x16xf32>
    %27 = vector.broadcast %5 : f32 to vector<2x16x16xf32>
    %28 = arith.mulf %27, %26 : vector<2x16x16xf32>
    %29 = arith.addf %25, %28 : vector<2x16x16xf32>
    %30 = vector.extract_strided_slice %29 {offsets = [0, 2, 0], sizes = [2, 1, 16], strides = [1, 1, 1]} : vector<2x16x16xf32> to vector<2x1x16xf32>
    %31 = vector.extract_strided_slice %29 {offsets = [0, 1, 0], sizes = [2, 1, 16], strides = [1, 1, 1]} : vector<2x16x16xf32> to vector<2x1x16xf32>
    %32 = vector.extract_strided_slice %29 {offsets = [0, 14, 0], sizes = [2, 1, 16], strides = [1, 1, 1]} : vector<2x16x16xf32> to vector<2x1x16xf32>
    %33 = vector.extract_strided_slice %29 {offsets = [0, 13, 0], sizes = [2, 1, 16], strides = [1, 1, 1]} : vector<2x16x16xf32> to vector<2x1x16xf32>
    %34 = tpu.concatenate %30, %31, %29, %32, %33 in 1 : vector<2x1x16xf32>, vector<2x1x16xf32>, vector<2x16x16xf32>, vector<2x1x16xf32>, vector<2x1x16xf32> -> vector<2x20x16xf32>
    %35 = vector.extract_strided_slice %34 {offsets = [0, 0, 0], sizes = [2, 16, 16], strides = [1, 1, 1]} : vector<2x20x16xf32> to vector<2x16x16xf32>
    %36 = vector.broadcast %1 : f32 to vector<2x16x16xf32>
    %37 = arith.mulf %36, %35 : vector<2x16x16xf32>
    %38 = vector.extract_strided_slice %34 {offsets = [0, 1, 0], sizes = [2, 16, 16], strides = [1, 1, 1]} : vector<2x20x16xf32> to vector<2x16x16xf32>
    %39 = vector.broadcast %2 : f32 to vector<2x16x16xf32>
    %40 = arith.mulf %39, %38 : vector<2x16x16xf32>
    %41 = arith.addf %37, %40 : vector<2x16x16xf32>
    %42 = vector.extract_strided_slice %34 {offsets = [0, 2, 0], sizes = [2, 16, 16], strides = [1, 1, 1]} : vector<2x20x16xf32> to vector<2x16x16xf32>
    %43 = vector.broadcast %3 : f32 to vector<2x16x16xf32>
    %44 = arith.mulf %43, %42 : vector<2x16x16xf32>
    %45 = arith.addf %41, %44 : vector<2x16x16xf32>
    %46 = vector.extract_strided_slice %34 {offsets = [0, 3, 0], sizes = [2, 16, 16], strides = [1, 1, 1]} : vector<2x20x16xf32> to vector<2x16x16xf32>
    %47 = vector.broadcast %4 : f32 to vector<2x16x16xf32>
    %48 = arith.mulf %47, %46 : vector<2x16x16xf32>
    %49 = arith.addf %45, %48 : vector<2x16x16xf32>
    %50 = vector.extract_strided_slice %34 {offsets = [0, 4, 0], sizes = [2, 16, 16], strides = [1, 1, 1]} : vector<2x20x16xf32> to vector<2x16x16xf32>
    %51 = vector.broadcast %5 : f32 to vector<2x16x16xf32>
    %52 = arith.mulf %51, %50 : vector<2x16x16xf32>
    %53 = arith.addf %49, %52 : vector<2x16x16xf32>
    %c0_3 = arith.constant 0 : index
    %c0_4 = arith.constant 0 : index
    %c0_5 = arith.constant 0 : index
    %54 = vector.load %arg3[%c0_3, %c0_4, %c0_5] : memref<2x16x16xf32, #tpu.memory_space<vmem>>, vector<2x16x16xf32>
    tpu.vector_store %arg3[%c0_3, %c0_4, %c0_5], %53 {strides = array<i32>} : memref<2x16x16xf32, #tpu.memory_space<vmem>>, vector<2x16x16xf32>,
    return
  }
  func.func @transform_0(%arg0: i32) -> i32 {
    %c0_i32 = arith.constant 0 : i32
    %c0_i32_0 = arith.constant 0 : i32
    return %c0_i32 : i32
  }
  func.func @transform_1(%arg0: i32) -> (i32, i32, i32) {
    %c0_i32 = arith.constant 0 : i32
    %c0_i32_0 = arith.constant 0 : i32
    %c0_i32_1 = arith.constant 0 : i32
    return %arg0, %c0_i32, %c0_i32_0 : i32, i32, i32
  }
  func.func @transform_2(%arg0: i32) -> (i32, i32, i32) {
    %c0_i32 = arith.constant 0 : i32
    %c0_i32_0 = arith.constant 0 : i32
    %c0_i32_1 = arith.constant 0 : i32
    return %arg0, %c0_i32, %c0_i32_0 : i32, i32, i32
  }
}

</mosaic_0001>

<bundles_post_ra>
// kernel: tpu_custom_call.1
= control target key start
LH: loop header
LB: loop body
LE: loop exit
PB: predicated region body
PF: predicated region fallthrough
CT: control target
= control target key end

     0   :  { %7 = vsyncpa [#allocation5], 0  ;;  %s705_s0 = inlined_call_operand.hbm [shape: f32[5], index: 0, kind: input, shape index: {}]   ;;  %s706_s1 = inlined_call_operand.hbm [shape: f32[2,16,16], index: 1, kind: input, shape index: {}]   ;;  %s707_s2 = inlined_call_operand.hbm [shape: f32[2,16,16], index: 2, kind: output, shape index: {}]  }
   0x1   :  { %8 = vsyncpa [#allocation3], 0 }
   0x2   :  { %9 = vsyncpa [#allocation4], 0  ;;  %s429_s11 = scalar_lea.hbm %s705_s0, 16 }
   0x3   :  { %p430_p0 = scmp.ne.s32.totalorder %s705_s0, %s429_s11  ;;  %p433_p1 = scmp.lt.u32.totalorder %s429_s11, %s705_s0 }
   0x5   :  { %p435_p2 = pnand %p433_p1, %p430_p0 }
   0x7   :  { %438 = shalt.err (!%p435_p2)
}
   0x8   :  { %s489_s16 = smov [#allocation2]   ;;  %s490_s19 = smov [#allocation6]  }
   0x9   :  { %17 = dma.hbm_to_smem %s705_s0, 16, %s489_s16, [#allocation5]  }
   0xa   :  { %s23_s20 = sshll.u32 %s490_s19, 4  ;;  %s439_s23 = scalar_lea.hbm %s706_s1, 512  ;;  %s24_s20 = int_to_ptr.vmem [resolvable:$true] %s23_s20 }
   0xb   :  { %p440_p3 = scmp.ne.s32.totalorder %s706_s1, %s439_s23  ;;  %p443_p4 = scmp.lt.u32.totalorder %s439_s23, %s706_s1 }
   0xd   :  { %p445_p5 = pnand %p443_p4, %p440_p3 }
   0xf   :  { %448 = shalt.err (!%p445_p5)
}
  0x10   :  { %s449_s28 = scalar_lea.vmem %s24_s20, 512  ;;  %p454_p7 = scmp.lt.s32.totalorder %s24_s20, %s24_s20 }
  0x11   :  { %p450_p6 = scmp.ne.s32.totalorder %s24_s20, %s449_s28  ;;  %p455_p8 = scmp.lt.s32.totalorder %s449_s28, %s449_s28 }
  0x13   :  { %p456_p9 = por %p455_p8, %p454_p7 }
  0x15   :  { %p457_p10 = pnand %p456_p9, %p450_p6 }
  0x17   :  { %460 = shalt.err (!%p457_p10)
}
  0x18   :  { %s491_s0 = smov 128   ;;  %s492_s29 = smov 8  }
  0x19   :  { %29 = dma.hbm_to_vmem [thread:$0]  %s706_s1, 512, %s24_s20, [#allocation3], %s491_s0, %s491_s0, %s492_s29  }
  0x1a   :  { %483 = dma.done.wait [#allocation5], 16  }
  0x1b   :  { %484 = vsyncadd [#allocation5], 4294967280 }
  0x1c   :  { %485 = dma.done.wait [#allocation3], 512  }
  0x1d   :  { %486 = vsyncadd [#allocation3], 4294966784 }
  0x1e   :  { %36 = sfence }
  0x1f   :  { %v39_v0 = vld [vmem:[#allocation6 + $0x10] sm:$0xff]  ;;  %v37_v1 = vld [vmem:[#allocation6] sm:$0xff]  ;;  %s493_s4 = smov 126   ;;  %v40_v2 = vld [vmem:[#allocation6 + $0x18] sm:$0xff]  ;;  %s494_s5 = smov 2   ;;  %vm98_vm0 = vcmask 7168  }
  0x20   :  { %54 = vrot.lane.b32.xlu1 %v39_v0, %s493_s4  ;;  %50 = vrot.lane.b32.xlu0 %v37_v1, %s493_s4  ;;  %v38_v3 = vld [vmem:[#allocation6 + $0x8] sm:$0xff]  ;;  %s495_s1 = smov 4   ;;  %s496_s6 = smov 6   ;;  %vm103_vm1 = vcmask 15360   ;;  %vm108_vm2 = vcmask 146432   ;;  %vm113_vm3 = vcmask 154624  }
  0x21   :  { %s413_s7 = sld [smem:[#allocation2 + $0x1]]  ;;  %s414_s8 = sld [smem:[#allocation2 + $0x2]]  ;;  %vm231_vm4 = vcmask 1041408   ;;  %vm259_vm5 = vcmask 1042432   ;;  %vm252_vm6 = vcmask 1040384   ;;  %vm278_vm7 = vcmask 1046528  }
  0x22   :  { %s497_s9 = smov 127   ;;  %s415_s10 = sld [smem:[#allocation2 + $0x3]]  ;;  %vm309_vm8 = vcmask 1045504   ;;  %vm340_vm9 = vcmask 1044480   ;;  %vm371_vm10 = vcmask 1043456   ;;  %vm390_vm11 = vcmask 130048  }
  0x23   :  { %s416_s11 = sld [smem:[#allocation2 + $0x4]]  ;;  %s498_s12 = smov 125  }
  0x24   :  { %56 = vrot.lane.b32.xlu1 %v40_v2, %s493_s4  ;;  %52 = vrot.lane.b32.xlu0 %v38_v3, %s493_s4  ;;  %s499_s13 = smov 124   ;;  %s41_s14 = sld [smem:[#allocation2]] }
  0x25   :  { %s500_s15 = smov [#allocation7]  }
  0x26   :  { %s400_s16 = sshll.u32 %s500_s15, 4  ;;  %s401_s16 = int_to_ptr.vmem [resolvable:$true] %s400_s16 }
  0x27   :  { %v551_v20 = vstv %s413_s7  ;;  %v575_v41 = vstv %s414_s8  ;;  %s461_s17 = scalar_lea.vmem %s401_s16, 512  ;;  %p466_p12 = scmp.lt.s32.totalorder %s401_s16, %s401_s16 }
  0x28   :  { %64 = vrot.lane.b32.xlu1 %v38_v3, %s494_s5  ;;  %62 = vrot.lane.b32.xlu0 %v37_v1, %s494_s5  ;;  %v585_v46 = vstv %s415_s10  ;;  %p462_p11 = scmp.ne.s32.totalorder %s401_s16, %s461_s17  ;;  %p467_p13 = scmp.lt.s32.totalorder %s461_s17, %s461_s17 }
  0x29   :  { %v595_v51 = vstv %s416_s11 }
  0x2a   :  { %p468_p0 = por %p467_p13, %p466_p12 }
  0x2c   :  { %68 = vrot.lane.b32.xlu1 %v40_v2, %s494_s5  ;;  %66 = vrot.lane.b32.xlu0 %v39_v0, %s494_s5  ;;  %p469_p1 = pnand %p468_p0, %p462_p11 }
  0x30   :  { %76 = vrot.lane.b32.xlu1 %v38_v3, %s495_s1  ;;  %74 = vrot.lane.b32.xlu0 %v37_v1, %s495_s1 }
  0x34   :  { %80 = vrot.lane.b32.xlu1 %v40_v2, %s495_s1  ;;  %78 = vrot.lane.b32.xlu0 %v39_v0, %s495_s1 }
  0x38   :  { %88 = vrot.lane.b32.xlu1 %v38_v3, %s496_s6  ;;  %86 = vrot.lane.b32.xlu0 %v37_v1, %s496_s6 }
  0x3c   :  { %92 = vrot.lane.b32.xlu1 %v40_v2, %s496_s6  ;;  %90 = vrot.lane.b32.xlu0 %v39_v0, %s496_s6 }
  0x92   :  { %v55_v4 = vpop.permute.xlu1 %54  ;;  %v51_v5 = vpop.permute.xlu0 %50 }
  0x93   :  { %v99_v16 = vsel %vm98_vm0, %v51_v5, %v37_v1  ;;  %v101_v27 = vsel %vm98_vm0, %v55_v4, %v39_v0  ;;  %v603_v0 = vstv %s41_s14 }
  0x96   :  { %v57_v6 = vpop.permute.xlu1 %56  ;;  %v53_v7 = vpop.permute.xlu0 %52 }
  0x97   :  { %v100_v17 = vsel %vm98_vm0, %v53_v7, %v38_v3  ;;  %v102_v28 = vsel %vm98_vm0, %v57_v6, %v40_v2 }
  0x9a   :  { %v65_v8 = vpop.permute.xlu1 %64  ;;  %v63_v9 = vpop.permute.xlu0 %62 }
  0x9b   :  { %v105_v18 = vsel %vm103_vm1, %v100_v17, %v65_v8  ;;  %v104_v19 = vsel %vm103_vm1, %v99_v16, %v63_v9 }
  0x9e   :  { %v69_v10 = vpop.permute.xlu1 %68  ;;  %v67_v11 = vpop.permute.xlu0 %66 }
  0x9f   :  { %v107_v31 = vsel %vm103_vm1, %v102_v28, %v69_v10  ;;  %v106_v32 = vsel %vm103_vm1, %v101_v27, %v67_v11 }
  0xa2   :  { %v77_v12 = vpop.permute.xlu1 %76  ;;  %v75_v13 = vpop.permute.xlu0 %74 }
  0xa3   :  { %v110_v21 = vsel %vm108_vm2, %v105_v18, %v77_v12  ;;  %v109_v22 = vsel %vm108_vm2, %v104_v19, %v75_v13 }
  0xa6   :  { %v81_v14 = vpop.permute.xlu1 %80  ;;  %v79_v15 = vpop.permute.xlu0 %78 }
  0xa7   :  { %v112_v33 = vsel %vm108_vm2, %v107_v31, %v81_v14  ;;  %v111_v34 = vsel %vm108_vm2, %v106_v32, %v79_v15 }
  0xaa   :  { %v89_v23 = vpop.permute.xlu1 %88  ;;  %v87_v24 = vpop.permute.xlu0 %86 }
  0xab   :  { %v556_v25 = vsel %vm113_vm3, %v110_v21, %v89_v23  ;;  %v559_v26 = vsel %vm113_vm3, %v109_v22, %v87_v24 }
  0xac   :  { %v125_v29 = vmul.f32 %v551_v20, %v556_v25  ;;  %v124_v30 = vmul.f32 %v551_v20, %v559_v26  ;;  %v150_v42 = vmul.f32 %v575_v41, %v556_v25  ;;  %v149_v43 = vmul.f32 %v575_v41, %v559_v26 }
  0xad   :  { %v175_v47 = vmul.f32 %v585_v46, %v556_v25  ;;  %v174_v48 = vmul.f32 %v585_v46, %v559_v26  ;;  %v200_v52 = vmul.f32 %v595_v51, %v556_v25  ;;  %v199_v53 = vmul.f32 %v595_v51, %v559_v26 }
  0xae   :  { %v93_v35 = vpop.permute.xlu1 %92  ;;  %134 = vrot.lane.b32.xlu1 %v125_v29, %s497_s9  ;;  %132 = vrot.lane.b32.xlu0 %v124_v30, %s497_s9  ;;  %v91_v36 = vpop.permute.xlu0 %90  ;;  %v120_v3 = vmul.f32 %v603_v0, %v556_v25  ;;  %v119_v4 = vmul.f32 %v603_v0, %v559_v26 }
  0xaf   :  { %v117_v37 = vsel %vm113_vm3, %v112_v33, %v93_v35  ;;  %v116_v38 = vsel %vm113_vm3, %v111_v34, %v91_v36 }
  0xb0   :  { %v127_v39 = vmul.f32 %v551_v20, %v117_v37  ;;  %v126_v40 = vmul.f32 %v551_v20, %v116_v38  ;;  %v152_v44 = vmul.f32 %v575_v41, %v117_v37  ;;  %v151_v45 = vmul.f32 %v575_v41, %v116_v38 }
  0xb1   :  { %v177_v49 = vmul.f32 %v585_v46, %v117_v37  ;;  %v176_v50 = vmul.f32 %v585_v46, %v116_v38  ;;  %v202_v54 = vmul.f32 %v595_v51, %v117_v37  ;;  %v201_v55 = vmul.f32 %v595_v51, %v116_v38 }
  0xb2   :  { %138 = vrot.lane.b32.xlu1 %v127_v39, %s497_s9  ;;  %136 = vrot.lane.b32.xlu0 %v126_v40, %s497_s9  ;;  %v122_v7 = vmul.f32 %v603_v0, %v117_v37  ;;  %v121_v13 = vmul.f32 %v603_v0, %v116_v38 }
  0xb6   :  { %159 = vrot.lane.b32.xlu1 %v150_v42, %s493_s4  ;;  %157 = vrot.lane.b32.xlu0 %v149_v43, %s493_s4 }
  0xba   :  { %163 = vrot.lane.b32.xlu1 %v152_v44, %s493_s4  ;;  %161 = vrot.lane.b32.xlu0 %v151_v45, %s493_s4 }
  0xbe   :  { %184 = vrot.lane.b32.xlu1 %v175_v47, %s498_s12  ;;  %182 = vrot.lane.b32.xlu0 %v174_v48, %s498_s12 }
  0xc2   :  { %188 = vrot.lane.b32.xlu1 %v177_v49, %s498_s12  ;;  %186 = vrot.lane.b32.xlu0 %v176_v50, %s498_s12 }
  0xc6   :  { %209 = vrot.lane.b32.xlu1 %v200_v52, %s499_s13  ;;  %207 = vrot.lane.b32.xlu0 %v199_v53, %s499_s13 }
  0xca   :  { %213 = vrot.lane.b32.xlu1 %v202_v54, %s499_s13  ;;  %211 = vrot.lane.b32.xlu0 %v201_v55, %s499_s13 }
 0x120   :  { %v135_v56 = vpop.permute.xlu1 %134  ;;  %v133_v57 = vpop.permute.xlu0 %132 }
 0x121   :  { %v145_v5 = vadd.f32 %v135_v56, %v120_v3  ;;  %v144_v6 = vadd.f32 %v133_v57, %v119_v4 }
 0x124   :  { %v139_v58 = vpop.permute.xlu1 %138  ;;  %v137_v59 = vpop.permute.xlu0 %136 }
 0x125   :  { %v147_v12 = vadd.f32 %v139_v58, %v122_v7  ;;  %v146_v16 = vadd.f32 %v137_v59, %v121_v13 }
 0x128   :  { %v160_v60 = vpop.permute.xlu1 %159  ;;  %v158_v61 = vpop.permute.xlu0 %157 }
 0x129   :  { %v170_v10 = vadd.f32 %v160_v60, %v145_v5  ;;  %v169_v11 = vadd.f32 %v158_v61, %v144_v6 }
 0x12c   :  { %v164_v62 = vpop.permute.xlu1 %163  ;;  %v162_v63 = vpop.permute.xlu0 %161 }
 0x12d   :  { %v172_v17 = vadd.f32 %v164_v62, %v147_v12  ;;  %v171_v23 = vadd.f32 %v162_v63, %v146_v16 }
 0x130   :  { %v185_v1 = vpop.permute.xlu1 %184  ;;  %v183_v2 = vpop.permute.xlu0 %182 }
 0x131   :  { %v195_v14 = vadd.f32 %v185_v1, %v170_v10  ;;  %v194_v15 = vadd.f32 %v183_v2, %v169_v11 }
 0x134   :  { %v189_v8 = vpop.permute.xlu1 %188  ;;  %v187_v9 = vpop.permute.xlu0 %186 }
 0x135   :  { %v197_v24 = vadd.f32 %v189_v8, %v172_v17  ;;  %v196_v29 = vadd.f32 %v187_v9, %v171_v23 }
 0x138   :  { %v210_v18 = vpop.permute.xlu1 %209  ;;  %v208_v19 = vpop.permute.xlu0 %207 }
 0x139   :  { %v220_v21 = vadd.f32 %v210_v18, %v195_v14  ;;  %v219_v22 = vadd.f32 %v208_v19, %v194_v15 }
 0x13b   :  { %v233_v25 = vrot.slane %v220_v21, 6  ;;  %v244_v26 = vrot.slane %v220_v21, 4  ;;  %v248_v27 = vrot.slane %v220_v21, 2  ;;  %v225_v28 = vrot.slane %v219_v22, 2 }
 0x13c   :  { %v232_v30 = vrot.slane %v219_v22, 6  ;;  %v214_v31 = vpop.permute.xlu1 %213  ;;  %v212_v32 = vpop.permute.xlu0 %211 }
 0x13d   :  { %v257_v33 = vsel %vm231_vm4, %v233_v25, %v244_v26  ;;  %v253_v34 = vsel %vm252_vm6, %v225_v28, %v219_v22  ;;  %v222_v35 = vadd.f32 %v214_v31, %v197_v24  ;;  %v221_v39 = vadd.f32 %v212_v32, %v196_v29 }
 0x13e   :  { %v260_v36 = vsel %vm259_vm5, %v257_v33, %v248_v27  ;;  %v615_v37 = vsel %vm231_vm4, %v232_v30, %v233_v25  ;;  %v255_v38 = vsel %vm231_vm4, %v253_v34, %v232_v30 }
 0x13f   :  { %v268_v40 = vmul.f32 %v260_v36, %v551_v20  ;;  %v299_v42 = vmul.f32 %v260_v36, %v575_v41  ;;  %v621_v43 = vmul.f32 %v260_v36, %v585_v46  ;;  %v624_v44 = vmul.f32 %v260_v36, %v595_v51 }
 0x140   :  { %v262_v45 = vmul.f32 %v255_v38, %v603_v0  ;;  %v266_v47 = vmul.f32 %v255_v38, %v551_v20  ;;  %v267_v48 = vmul.f32 %v615_v37, %v551_v20  ;;  %v297_v49 = vmul.f32 %v255_v38, %v575_v41 }
 0x141   :  { %v282_v50 = vrot.slane %v268_v40, 1  ;;  %v313_v52 = vrot.slane %v299_v42, 2  ;;  %v344_v53 = vrot.slane %v621_v43, 3  ;;  %v298_v54 = vmul.f32 %v615_v37, %v575_v41 }
 0x142   :  { %v279_v55 = vrot.slane %v266_v47, 1  ;;  %v280_v56 = vrot.slane %v267_v48, 1  ;;  %v310_v57 = vrot.slane %v297_v49, 2  ;;  %v635_v58 = vmul.f32 %v255_v38, %v585_v46 }
 0x143   :  { %v311_v59 = vrot.slane %v298_v54, 2  ;;  %v638_v60 = vmul.f32 %v255_v38, %v595_v51  ;;  %v236_v61 = vrot.slane %v222_v35, 6  ;;  %v245_v62 = vrot.slane %v222_v35, 4 }
 0x144   :  { %v341_v63 = vrot.slane %v635_v58, 3  ;;  %v249_v1 = vrot.slane %v222_v35, 2  ;;  %v226_v2 = vrot.slane %v221_v39, 2  ;;  %v235_v3 = vrot.slane %v221_v39, 6 }
 0x145   :  { %v258_v4 = vsel %vm231_vm4, %v236_v61, %v245_v62  ;;  %v263_v5 = vmul.f32 %v615_v37, %v603_v0  ;;  %v281_v6 = vsel %vm278_vm7, %v279_v55, %v280_v56  ;;  %v283_v7 = vsel %vm278_vm7, %v280_v56, %v282_v50 }
 0x146   :  { %v261_v8 = vsel %vm259_vm5, %v258_v4, %v249_v1  ;;  %v237_v9 = vsel %vm231_vm4, %v235_v3, %v236_v61  ;;  %v254_v10 = vsel %vm252_vm6, %v226_v2, %v221_v39  ;;  %v293_v11 = vadd.f32 %v281_v6, %v262_v45 }
 0x147   :  { %v271_v12 = vmul.f32 %v261_v8, %v551_v20  ;;  %v302_v13 = vmul.f32 %v261_v8, %v575_v41  ;;  %v333_v14 = vmul.f32 %v261_v8, %v585_v46  ;;  %v364_v15 = vmul.f32 %v261_v8, %v595_v51 }
 0x148   :  { %v256_v16 = vsel %vm231_vm4, %v254_v10, %v235_v3  ;;  %v270_v17 = vmul.f32 %v237_v9, %v551_v20  ;;  %v301_v18 = vmul.f32 %v237_v9, %v575_v41  ;;  %v265_v19 = vmul.f32 %v237_v9, %v603_v0 }
 0x149   :  { %v287_v21 = vrot.slane %v271_v12, 1  ;;  %v318_v22 = vrot.slane %v302_v13, 2  ;;  %v349_v23 = vrot.slane %v333_v14, 3  ;;  %v264_v24 = vmul.f32 %v256_v16, %v603_v0 }
 0x14a   :  { %v269_v25 = vmul.f32 %v256_v16, %v551_v20  ;;  %v285_v26 = vrot.slane %v270_v17, 1  ;;  %v300_v27 = vmul.f32 %v256_v16, %v575_v41  ;;  %v316_v28 = vrot.slane %v301_v18, 2 }
 0x14b   :  { %v331_v29 = vmul.f32 %v256_v16, %v585_v46  ;;  %v362_v30 = vmul.f32 %v256_v16, %v595_v51  ;;  %v294_v31 = vadd.f32 %v283_v7, %v263_v5  ;;  %v312_v32 = vsel %vm309_vm8, %v310_v57, %v311_v59 }
 0x14c   :  { %v284_v33 = vrot.slane %v269_v25, 1  ;;  %v315_v34 = vrot.slane %v300_v27, 2  ;;  %v288_v35 = vsel %vm278_vm7, %v285_v26, %v287_v21  ;;  %v314_v0 = vsel %vm309_vm8, %v311_v59, %v313_v52 }
 0x14d   :  { %v346_v36 = vrot.slane %v331_v29, 3  ;;  %v296_v20 = vadd.f32 %v288_v35, %v265_v19  ;;  %v319_v38 = vsel %vm309_vm8, %v316_v28, %v318_v22  ;;  %v324_v41 = vadd.f32 %v312_v32, %v293_v11 }
 0x14e   :  { %v286_v39 = vsel %vm278_vm7, %v284_v33, %v285_v26  ;;  %v317_v40 = vsel %vm309_vm8, %v315_v34, %v316_v28  ;;  %v325_v42 = vadd.f32 %v314_v0, %v294_v31  ;;  %v329_v45 = vmul.f32 %v615_v37, %v585_v46 }
 0x14f   :  { %v295_v47 = vadd.f32 %v286_v39, %v264_v24  ;;  %v327_v48 = vadd.f32 %v319_v38, %v296_v20  ;;  %v332_v49 = vmul.f32 %v237_v9, %v585_v46  ;;  %v360_v50 = vmul.f32 %v615_v37, %v595_v51 }
 0x150   :  { %v342_v52 = vrot.slane %v329_v45, 3  ;;  %v363_v54 = vmul.f32 %v237_v9, %v595_v51  ;;  %v372_v55 = vrot.slane %v638_v60, 4  ;;  %v375_v56 = vrot.slane %v624_v44, 4 }
 0x151   :  { %v326_v57 = vadd.f32 %v317_v40, %v295_v47  ;;  %v347_v58 = vrot.slane %v332_v49, 3  ;;  %v373_v59 = vrot.slane %v360_v50, 4  ;;  %v377_v61 = vrot.slane %v362_v30, 4 }
 0x152   :  { %v343_v62 = vsel %vm340_vm9, %v341_v63, %v342_v52  ;;  %v345_v46 = vsel %vm340_vm9, %v342_v52, %v344_v53  ;;  %v378_v1 = vrot.slane %v363_v54, 4  ;;  %v380_v2 = vrot.slane %v364_v15, 4 }
 0x153   :  { %v348_v37 = vsel %vm340_vm9, %v346_v36, %v347_v58  ;;  %v350_v51 = vsel %vm340_vm9, %v347_v58, %v349_v23  ;;  %v355_v3 = vadd.f32 %v343_v62, %v324_v41  ;;  %v356_v60 = vadd.f32 %v345_v46, %v325_v42 }
 0x154   :  { %v357_v44 = vadd.f32 %v348_v37, %v326_v57  ;;  %v358_v4 = vadd.f32 %v350_v51, %v327_v48  ;;  %v374_v5 = vsel %vm371_vm10, %v372_v55, %v373_v59  ;;  %v376_v63 = vsel %vm371_vm10, %v373_v59, %v375_v56 }
 0x155   :  { %v379_v43 = vsel %vm371_vm10, %v377_v61, %v378_v1  ;;  %v381_v53 = vsel %vm371_vm10, %v378_v1, %v380_v2  ;;  %v386_v6 = vadd.f32 %v374_v5, %v355_v3  ;;  %v387_v7 = vadd.f32 %v376_v63, %v356_v60 }
 0x156   :  { %v388_v8 = vadd.f32 %v379_v43, %v357_v44  ;;  %v389_v9 = vadd.f32 %v381_v53, %v358_v4 }
 0x157   :  { %391 = vst.msk [vmem:[#allocation7] sm:$0xff] %vm390_vm11, %v386_v6  ;;  %392 = vst.msk [vmem:[#allocation7 + $0x8] sm:$0xff] %vm390_vm11, %v387_v7 }
 0x158   :  { %393 = vst.msk [vmem:[#allocation7 + $0x10] sm:$0xff] %vm390_vm11, %v388_v8  ;;  %394 = vst.msk [vmem:[#allocation7 + $0x18] sm:$0xff] %vm390_vm11, %v389_v9 }
 0x159   :  { %472 = shalt.err (!%p469_p1)
}
 0x15a   :  { %s473_s20 = scalar_lea.hbm %s707_s2, 512 }
 0x15b   :  { %p474_p2 = scmp.ne.s32.totalorder %s707_s2, %s473_s20  ;;  %p477_p3 = scmp.lt.u32.totalorder %s473_s20, %s707_s2 }
 0x15d   :  { %p479_p4 = pnand %p477_p3, %p474_p2 }
 0x15f   :  { %482 = shalt.err (!%p479_p4)
}
 0x160   :  { %406 = dma.vmem_to_hbm [thread:$0]  %s401_s16, 512, %s707_s2, [#allocation4], %s491_s0, %s491_s0, %s492_s29  }
 0x161   :  { %487 = dma.done.wait [#allocation4], 512  }
 0x162   :  { %488 = vsyncadd [#allocation4], 4294966784 }
 0x163   :  { %410 = vsyncpa [#allocation3], 1 }
 0x164   :  { %411 = vsyncpa [#allocation4], 1 }
 0x165   :  { %412 = vsyncpa [#allocation5], 1 }

</bundles_post_ra>
